<compile_context>
chip_gen: v7x
topology: tpu7x:2x2x1
jax: 0.10.0
libtpu: 0.0.40
codegen_flags: <defaults>
</compile_context>

<pallas_src>
import functools

import jax
import jax.numpy as jnp
from jax.experimental import pallas as pl
from jax.experimental.pallas import tpu as pltpu

LANE = 128
SUBLANE = 8


def _round_up(n, m):
    return ((n + m - 1) // m) * m


def _softplus(x):
    # numerically-safe softplus (f32)
    return jnp.where(x > 20.0, x, jnp.log1p(jnp.exp(jnp.minimum(x, 20.0))))


def _decoder_kernel(num_mid, final_out, x_ref, rb_ref, w0x_ref, *rest):
    """One (batch, seq-tile) grid step of the fused decoder MLP.

    rest = (w1, b1, ..., w_num_mid, b_num_mid, w_last_t, b_last_col, out_ref)
    rb_ref holds the precomputed r-projection bias (r @ W0r + b0), either per batch
    (1 row, broadcast over tokens) or per token (3-D r case).
    """
    out_ref = rest[-1]
    b_last_ref = rest[-2]       # (8, 1)            f32
    w_last_t_ref = rest[-3]     # (8, H_last_pad)   bf16 (transposed final weight)
    mids = rest[:-3]

    x = x_ref[0]                # (TILE_S, X)  original dtype, unpadded feature dim

    # ---- layer 0:  concat([x, r]) @ W0 + b0  ==  x @ W0x + (r @ W0r + b0) ----
    # The r half is hoisted to the wrapper (per-batch), streamed via rb_ref.
    h32 = jnp.dot(x, w0x_ref[...], preferred_element_type=jnp.float32)
    h32 = h32 + rb_ref[0].astype(jnp.float32)        # (1,H0) or (TILE_S,H0) broadcast
    # ReLU on packed bf16: halves VALU + vld/vst slot traffic on v6e/v7x; relu
    # commutes with the cast so numerics match doing it in f32 first.
    h = jnp.maximum(h32.astype(jnp.bfloat16), 0.0)

    # ---- hidden layers (Linear + ReLU), bf16 operands / f32 MXU accumulation ----
    # Note: 128-wide hiddens cap MXU utilization at ~25% on v6e/v7x (perfect fit on
    # v5e's 4x128x128 MXU); widening the model is the only way past that ceiling.
    for i in range(num_mid):
        w_ref = mids[2 * i]
        b_ref = mids[2 * i + 1]
        h32 = jnp.dot(h, w_ref[...], preferred_element_type=jnp.float32) + b_ref[...]
        h = jnp.maximum(h32.astype(jnp.bfloat16), 0.0)

    # ---- final layer, emitted transposed so tokens stay lane-dense in the output --
    # out_t[o, t] = sum_k W_last[k, o] * h[t, k]
    # NOTE(review): this contraction form is kept because it is verified to lower and
    # run cleanly. If a bundle/MLIR dump shows Mosaic materializing an XLU transpose
    # of the full (TILE_S, H_pad) activation here, restructure to
    # out_small = jnp.dot(h, w_last) -> (TILE_S, 8) and transpose only that result.
    out_t = jax.lax.dot_general(
        w_last_t_ref[...], h,
        dimension_numbers=(((1,), (1,)), ((), ())),
        preferred_element_type=jnp.float32)            # (8, TILE_S)
    out_t = out_t + b_last_ref[...]                    # (8, 1) broadcasts over lanes

    if final_out == 2:
        # sigma transform only on sublane row 1 (mu row 0 untouched).
        row = jax.lax.broadcasted_iota(jnp.int32, out_t.shape, 0)
        out_t = jnp.where(row == 1, 0.1 + 0.9 * _softplus(out_t), out_t)

    out_ref[0] = out_t[:final_out, :].astype(out_ref.dtype)   # (final_out, TILE_S)


def prepare_decoder_params(weights, biases, x_dim, r_dim, output_sizes,
                           param_dtype=jnp.bfloat16):
    """One-time parameter prep (hoisted out of the per-call path).

    Splits layer 0 into x / r halves. The x half keeps its (tiny) contraction dim
    unpadded so x can be streamed straight from HBM with no wrapper-side copy; the
    r half + layer-0 bias are returned separately because the wrapper consumes them
    (the per-batch r projection is hoisted out of the kernel). Hidden-layer feature
    dims are padded to 128 lanes; the final layer is stored transposed (8 sublane
    rows) so the kernel emits a lane-dense (mu, sigma) output.
    """
    num_layers = len(output_sizes)
    assert num_layers >= 2, "kernel expects >= 2 linear layers"   # TODO(synk): 1-layer MLP path
    final_out = output_sizes[-1]
    assert final_out in (1, 2)

    dims = [x_dim + r_dim] + list(output_sizes)
    hid_pad = [_round_up(d, LANE) for d in output_sizes[:-1]]

    w0 = jnp.asarray(weights[0], jnp.float32)                 # (x_dim + r_dim, h0)
    b0 = jnp.asarray(biases[0], jnp.float32)
    h0, h0p = output_sizes[0], hid_pad[0]
    # x half of layer 0: contraction dim unpadded; kept f32 (tiny) so x streams in
    # its original dtype.
    w0x = jnp.zeros((x_dim, h0p), jnp.float32).at[:, :h0].set(w0[:x_dim])
    # r half + bias: consumed by the wrapper-side hoisted projection.
    w0r = jnp.zeros((r_dim, h0p), jnp.float32).at[:, :h0].set(w0[x_dim:])
    b0p = jnp.zeros((1, h0p), jnp.float32).at[0, :h0].set(b0)

    kernel_params = [w0x]
    for l in range(1, num_layers - 1):
        w = jnp.asarray(weights[l], jnp.float32)
        b = jnp.asarray(biases[l], jnp.float32)
        wp = jnp.zeros((hid_pad[l - 1], hid_pad[l]), jnp.float32)
        wp = wp.at[:dims[l], :dims[l + 1]].set(w)
        bp = jnp.zeros((1, hid_pad[l]), jnp.float32).at[0, :dims[l + 1]].set(b)
        kernel_params += [wp.astype(param_dtype), bp]

    # Final layer: stored transposed, sublane-padded to 8 rows.
    wl = jnp.asarray(weights[-1], jnp.float32)                # (h_last, final_out)
    bl = jnp.asarray(biases[-1], jnp.float32)
    wlt = jnp.zeros((SUBLANE, hid_pad[-1]), jnp.float32)
    wlt = wlt.at[:final_out, :dims[-2]].set(wl.T)
    blc = jnp.zeros((SUBLANE, 1), jnp.float32).at[:final_out, 0].set(bl)
    kernel_params += [wlt.astype(param_dtype), blc]

    return {
        "w0r": w0r.astype(param_dtype),   # (r_dim, h0_pad) for wrapper-side projection
        "b0": b0p,                        # (1, h0_pad) f32
        "kernel": tuple(kernel_params),
    }


def _tile_vmem_bytes(shape, dtype):
    itemsize = jnp.dtype(dtype).itemsize
    sub = max(SUBLANE, 32 // itemsize)        # 8 for f32, 16 for bf16
    lead = 1
    for d in shape[:-2]:
        lead *= int(d)
    return lead * _round_up(int(shape[-2]), sub) * _round_up(int(shape[-1]), LANE) * itemsize


def decoder_forward(x, r, params, output_sizes, *, tile_s=1024,
                    act_dtype=jnp.bfloat16):
    """x: [B, S, X]; r: [B, R] or [B, S, R]. Returns (mu, sigma) or mu, each [B, S]."""
    B, S, X = x.shape
    final_out = output_sizes[-1]
    num_mid = len(output_sizes) - 2
    h0_pad = _round_up(output_sizes[0], LANE)
    hid_pad_max = max(_round_up(d, LANE) for d in output_sizes[:-1])
    kernel_params = params["kernel"]

    # Sequence tiling: one full-extent tile for small S, otherwise 1024-token tiles
    # (multiple of 128 keeps the lane-dense output stores unmasked). The ragged last
    # tile is handled by Pallas, so x is never copied / zero-padded in HBM.
    # TODO(synk): for the small-S / large-B regime, flatten (B, S) into one token
    # axis with a scalar-prefetched per-tile batch table to regain >=128-lane tiles.
    TILE_S = S if S <= tile_s else tile_s
    n_s_tiles = pl.cdiv(S, TILE_S)

    x_spec = pl.BlockSpec((1, TILE_S, X), lambda b, s: (b, s, 0))

    # ---- hoisted layer-0 r projection:  rb = r @ W0r + b0 ----
    w0r, b0 = params["w0r"], params["b0"]
    if r.ndim == 2:
        rb = jnp.dot(r.astype(act_dtype), w0r,
                     preferred_element_type=jnp.float32) + b0        # (B, h0_pad) f32
        rb = rb[:, None, :]                                          # (B, 1, h0_pad)
        rb_block = (1, 1, h0_pad)
        rb_spec = pl.BlockSpec(rb_block, lambda b, s: (b, 0, 0))
    else:
        # Per-token r: still fold the layer-0 r half outside the kernel so the kernel
        # stays a single code path; rb streams as bf16.
        rb = jnp.einsum("bsr,rh->bsh",
                        r.astype(act_dtype).astype(jnp.float32),
                        w0r.astype(jnp.float32)) + b0
        rb = rb.astype(act_dtype)                                    # (B, S, h0_pad)
        rb_block = (1, TILE_S, h0_pad)
        rb_spec = pl.BlockSpec(rb_block, lambda b, s: (b, s, 0))

    # Weights/biases: full blocks, constant index_map -> VMEM-resident across the
    # grid. (If hidden widths grow into the multi-MiB range on v7x's 64 MiB VMEM,
    # consider pipeline_mode=pl.Buffered(1) on these specs to single-buffer them.)
    w_specs = [pl.BlockSpec(p.shape, lambda b, s: (0, 0)) for p in kernel_params]

    out_block = (1, final_out, TILE_S)
    out_spec = pl.BlockSpec(out_block, lambda b, s: (b, 0, s))

    # VMEM budget: double-buffered streamed tiles + (assumed double-buffered)
    # resident params + activation scratch + margin, capped at ~45% of the actual
    # generation's VMEM capacity (v7x: 64 MiB, v5e/v6e: 128 MiB).
    vmem_bytes = 2 * (_tile_vmem_bytes((1, TILE_S, X), x.dtype)
                      + _tile_vmem_bytes(rb_block, rb.dtype)
                      + _tile_vmem_bytes(out_block, jnp.float32))
    vmem_bytes += 2 * sum(_tile_vmem_bytes(p.shape, p.dtype) for p in kernel_params)
    vmem_bytes += 3 * _round_up(TILE_S, SUBLANE) * hid_pad_max * 4   # activation scratch
    vmem_bytes += 2 << 20                                            # margin
    try:
        cap = int(0.45 * int(pltpu.get_tpu_info().vmem_capacity_bytes))
    except Exception:
        cap = 48 << 20
    vmem_bytes = min(max(vmem_bytes, 16 << 20), cap)

    kernel = functools.partial(_decoder_kernel, num_mid, final_out)

    out = pl.pallas_call(
        kernel,
        out_shape=jax.ShapeDtypeStruct((B, final_out, S), jnp.float32),
        grid=(B, n_s_tiles),
        in_specs=[x_spec, rb_spec] + w_specs,
        out_specs=out_spec,
        compiler_params=pltpu.CompilerParams(
            dimension_semantics=("parallel", "parallel"),
            vmem_limit_bytes=vmem_bytes),
    )(x, rb, *kernel_params)

    # out is (B, final_out, S), lane-dense over tokens (no padding to slice off).
    if final_out == 2:
        return out[:, 0, :], out[:, 1, :]
    return out[:, 0, :]


def _reference_forward(x, r, weights, biases, output_sizes):
    B, S, _ = x.shape
    if r.ndim == 2:
        r = jnp.broadcast_to(r[:, None, :], (B, S, r.shape[-1]))
    h = jnp.concatenate([x, r], axis=-1)
    for l, (w, b) in enumerate(zip(weights, biases)):
        h = h @ w + b
        if l < len(weights) - 1:
            h = jax.nn.relu(h)
    if output_sizes[-1] == 2:
        mu = h[:, :, 0]
        sigma = 0.1 + 0.9 * jax.nn.softplus(h[:, :, 1])
        return mu, sigma
    return h[:, :, 0]


if __name__ == "__main__":
    # Small shapes: B=2, S=8, x-dim=3, latent r-dim=32
    B, S, XD, RD = 2, 8, 3, 32
    output_sizes = [32, 32, 2]          # final size 2 -> (mu, sigma)
    input_size = XD + RD

    key = jax.random.PRNGKey(0)
    kx, kr, *kws = jax.random.split(key, 2 + 2 * len(output_sizes))

    x = jax.random.normal(kx, (B, S, XD), jnp.float32)
    r = jax.random.normal(kr, (B, RD), jnp.float32)

    dims = [input_size] + output_sizes
    weights, biases = [], []
    for l in range(len(output_sizes)):
        wk, bk = kws[2 * l], kws[2 * l + 1]
        scale = 1.0 / jnp.sqrt(jnp.float32(dims[l]))
        weights.append(scale * jax.random.normal(wk, (dims[l], dims[l + 1]), jnp.float32))
        biases.append(0.01 * jax.random.normal(bk, (dims[l + 1],), jnp.float32))

    # One-time parameter prep (padding / splitting / transposing hoisted out of fwd).
    params = prepare_decoder_params(weights, biases, XD, RD, output_sizes)

    fwd = jax.jit(functools.partial(decoder_forward, output_sizes=output_sizes))
    mu, sigma = fwd(x, r, params)
    jax.block_until_ready((mu, sigma))

    # Reference in f32. The kernel uses bf16 weights / r and bf16 inter-layer
    # activations with f32 MXU accumulation (the reference keeps f32 activations),
    # so compare against bf16-rounded weights/r at a 2e-2 tolerance.
    def _bf16(a):
        return a.astype(jnp.bfloat16).astype(jnp.float32)

    mu_ref, sigma_ref = _reference_forward(
        x, _bf16(r), [_bf16(w) for w in weights], biases, output_sizes)

    assert mu.shape == (B, S) and sigma.shape == (B, S)
    assert jnp.allclose(mu, mu_ref, atol=2e-2, rtol=2e-2), \
        float(jnp.max(jnp.abs(mu - mu_ref)))
    assert jnp.allclose(sigma, sigma_ref, atol=2e-2, rtol=2e-2), \
        float(jnp.max(jnp.abs(sigma - sigma_ref)))

    print("KERNEL_OK")
</pallas_src>

<mosaic_0001>
module attributes {stable_mosaic.version = 11 : i64} {
  func.func @_decoder_kernel(%arg0: i32, %arg1: i32, %arg2: memref<1x8x3xf32, #tpu.memory_space<vmem>>, %arg3: memref<1x1x128xf32, #tpu.memory_space<vmem>>, %arg4: memref<3x128xf32, #tpu.memory_space<vmem>>, %arg5: memref<128x128xbf16, #tpu.memory_space<vmem>>, %arg6: memref<1x128xf32, #tpu.memory_space<vmem>>, %arg7: memref<8x128xbf16, #tpu.memory_space<vmem>>, %arg8: memref<8x1xf32, #tpu.memory_space<vmem>>, %arg9: memref<1x2x8xf32, #tpu.memory_space<vmem>>) attributes {dimension_semantics = [#tpu.dimension_semantics<parallel>, #tpu.dimension_semantics<parallel>], iteration_bounds = array<i64: 2, 1>, scalar_prefetch = 0 : i64, scratch_operands = 0 : i64, tpu.core_type = #tpu.core_type<tc>, window_params = [{transform_indices = @transform_0, window_bounds = array<i64: 1, 8, 3>}, {transform_indices = @transform_1, window_bounds = array<i64: 1, 1, 128>}, {pipeline_mode = #tpu.pipeline_mode<synchronous>, transform_indices = @transform_2, window_bounds = array<i64: 3, 128>}, {pipeline_mode = #tpu.pipeline_mode<synchronous>, transform_indices = @transform_3, window_bounds = array<i64: 128, 128>}, {pipeline_mode = #tpu.pipeline_mode<synchronous>, transform_indices = @transform_4, window_bounds = array<i64: 1, 128>}, {pipeline_mode = #tpu.pipeline_mode<synchronous>, transform_indices = @transform_5, window_bounds = array<i64: 8, 128>}, {pipeline_mode = #tpu.pipeline_mode<synchronous>, transform_indices = @transform_6, window_bounds = array<i64: 8, 1>}, {transform_indices = @transform_7, window_bounds = array<i64: 1, 2, 8>}]} {
    %c0 = arith.constant 0 : index
    %c0_0 = arith.constant 0 : index
    %c0_1 = arith.constant 0 : index
    %0 = vector.load %arg2[%c0, %c0_0, %c0_1] : memref<1x8x3xf32, #tpu.memory_space<vmem>>, vector<1x8x3xf32>
    %1 = vector.shape_cast %0 : vector<1x8x3xf32> to vector<8x3xf32>
    %c0_2 = arith.constant 0 : index
    %c0_3 = arith.constant 0 : index
    %2 = vector.load %arg4[%c0_2, %c0_3] : memref<3x128xf32, #tpu.memory_space<vmem>>, vector<3x128xf32>
    %cst = arith.constant dense<0.000000e+00> : vector<8x128xf32>
    %3 = tpu.matmul %1, %2, %cst {dimension_numbers = #tpu.dot_dimension_numbers<[1], [0], [0], [1], [0, 0, 1, 1], [], []>} : vector<8x3xf32>, vector<3x128xf32>, vector<8x128xf32> -> vector<8x128xf32>
    %c0_4 = arith.constant 0 : index
    %c0_5 = arith.constant 0 : index
    %c0_6 = arith.constant 0 : index
    %4 = vector.load %arg3[%c0_4, %c0_5, %c0_6] : memref<1x1x128xf32, #tpu.memory_space<vmem>>, vector<1x1x128xf32>
    %5 = vector.shape_cast %4 : vector<1x1x128xf32> to vector<1x128xf32>
    %6 = vector.broadcast %5 : vector<1x128xf32> to vector<8x128xf32>
    %7 = arith.addf %3, %6 : vector<8x128xf32>
    %8 = arith.truncf %7 : vector<8x128xf32> to vector<8x128xbf16>
    %cst_7 = arith.constant 0.000000e+00 : bf16
    %9 = vector.broadcast %cst_7 : bf16 to vector<8x128xbf16>
    %10 = arith.maximumf %8, %9 : vector<8x128xbf16>
    %c0_8 = arith.constant 0 : index
    %c0_9 = arith.constant 0 : index
    %11 = vector.load %arg5[%c0_8, %c0_9] : memref<128x128xbf16, #tpu.memory_space<vmem>>, vector<128x128xbf16>
    %cst_10 = arith.constant dense<0.000000e+00> : vector<8x128xf32>
    %12 = tpu.matmul %10, %11, %cst_10 {dimension_numbers = #tpu.dot_dimension_numbers<[1], [0], [0], [1], [0, 0, 1, 1], [], []>} : vector<8x128xbf16>, vector<128x128xbf16>, vector<8x128xf32> -> vector<8x128xf32>
    %c0_11 = arith.constant 0 : index
    %c0_12 = arith.constant 0 : index
    %13 = vector.load %arg6[%c0_11, %c0_12] : memref<1x128xf32, #tpu.memory_space<vmem>>, vector<1x128xf32>
    %14 = vector.broadcast %13 : vector<1x128xf32> to vector<8x128xf32>
    %15 = arith.addf %12, %14 : vector<8x128xf32>
    %16 = arith.truncf %15 : vector<8x128xf32> to vector<8x128xbf16>
    %cst_13 = arith.constant 0.000000e+00 : bf16
    %17 = vector.broadcast %cst_13 : bf16 to vector<8x128xbf16>
    %18 = arith.maximumf %16, %17 : vector<8x128xbf16>
    %c0_14 = arith.constant 0 : index
    %c0_15 = arith.constant 0 : index
    %19 = vector.load %arg7[%c0_14, %c0_15] : memref<8x128xbf16, #tpu.memory_space<vmem>>, vector<8x128xbf16>
    %cst_16 = arith.constant dense<0.000000e+00> : vector<8x8xf32>
    %20 = tpu.matmul %19, %18, %cst_16 {dimension_numbers = #tpu.dot_dimension_numbers<[1], [1], [0], [0], [0, 0, 1, 0], [], []>} : vector<8x128xbf16>, vector<8x128xbf16>, vector<8x8xf32> -> vector<8x8xf32>
    %c0_17 = arith.constant 0 : index
    %c0_18 = arith.constant 0 : index
    %21 = vector.load %arg8[%c0_17, %c0_18] : memref<8x1xf32, #tpu.memory_space<vmem>>, vector<8x1xf32>
    %22 = vector.broadcast %21 : vector<8x1xf32> to vector<8x8xf32>
    %23 = arith.addf %20, %22 : vector<8x8xf32>
    %24 = tpu.iota {dimensions = array<i32: 0>} : vector<8x8xi32>
    %c1_i32 = arith.constant 1 : i32
    %25 = vector.broadcast %c1_i32 : i32 to vector<8x8xi32>
    %26 = arith.cmpi eq, %24, %25 : vector<8x8xi32>
    %cst_19 = arith.constant 2.000000e+01 : f32
    %27 = vector.broadcast %cst_19 : f32 to vector<8x8xf32>
    %28 = arith.cmpf ogt, %23, %27 : vector<8x8xf32>
    %cst_20 = arith.constant 2.000000e+01 : f32
    %29 = vector.broadcast %cst_20 : f32 to vector<8x8xf32>
    %30 = arith.minimumf %23, %29 : vector<8x8xf32>
    %31 = math.exp %30 : vector<8x8xf32>
    %32 = math.log1p %31 : vector<8x8xf32>
    %33 = arith.select %28, %23, %32 : vector<8x8xi1>, vector<8x8xf32>
    %cst_21 = arith.constant 0.899999976 : f32
    %34 = vector.broadcast %cst_21 : f32 to vector<8x8xf32>
    %35 = arith.mulf %34, %33 : vector<8x8xf32>
    %cst_22 = arith.constant 1.000000e-01 : f32
    %36 = vector.broadcast %cst_22 : f32 to vector<8x8xf32>
    %37 = arith.addf %36, %35 : vector<8x8xf32>
    %38 = arith.select %26, %37, %23 : vector<8x8xi1>, vector<8x8xf32>
    %39 = vector.extract_strided_slice %38 {offsets = [0, 0], sizes = [2, 8], strides = [1, 1]} : vector<8x8xf32> to vector<2x8xf32>
    %c0_23 = arith.constant 0 : index
    %c0_24 = arith.constant 0 : index
    %c0_25 = arith.constant 0 : index
    %40 = vector.load %arg9[%c0_23, %c0_24, %c0_25] : memref<1x2x8xf32, #tpu.memory_space<vmem>>, vector<1x2x8xf32>
    %41 = vector.shape_cast %40 : vector<1x2x8xf32> to vector<2x8xf32>
    %42 = vector.shape_cast %39 : vector<2x8xf32> to vector<1x2x8xf32>
    tpu.vector_store %arg9[%c0_23, %c0_24, %c0_25], %42 {strides = array<i32>} : memref<1x2x8xf32, #tpu.memory_space<vmem>>, vector<1x2x8xf32>,
    return
  }
  func.func @transform_0(%arg0: i32, %arg1: i32) -> (i32, i32, i32) {
    %c0_i32 = arith.constant 0 : i32
    %c0_i32_0 = arith.constant 0 : i32
    return %arg0, %arg1, %c0_i32 : i32, i32, i32
  }
  func.func @transform_1(%arg0: i32, %arg1: i32) -> (i32, i32, i32) {
    %c0_i32 = arith.constant 0 : i32
    %c0_i32_0 = arith.constant 0 : i32
    %c0_i32_1 = arith.constant 0 : i32
    return %arg0, %c0_i32, %c0_i32_0 : i32, i32, i32
  }
  func.func @transform_2(%arg0: i32, %arg1: i32) -> (i32, i32) {
    %c0_i32 = arith.constant 0 : i32
    %c0_i32_0 = arith.constant 0 : i32
    %c0_i32_1 = arith.constant 0 : i32
    return %c0_i32, %c0_i32_0 : i32, i32
  }
  func.func @transform_3(%arg0: i32, %arg1: i32) -> (i32, i32) {
    %c0_i32 = arith.constant 0 : i32
    %c0_i32_0 = arith.constant 0 : i32
    %c0_i32_1 = arith.constant 0 : i32
    return %c0_i32, %c0_i32_0 : i32, i32
  }
  func.func @transform_4(%arg0: i32, %arg1: i32) -> (i32, i32) {
    %c0_i32 = arith.constant 0 : i32
    %c0_i32_0 = arith.constant 0 : i32
    %c0_i32_1 = arith.constant 0 : i32
    return %c0_i32, %c0_i32_0 : i32, i32
  }
  func.func @transform_5(%arg0: i32, %arg1: i32) -> (i32, i32) {
    %c0_i32 = arith.constant 0 : i32
    %c0_i32_0 = arith.constant 0 : i32
    %c0_i32_1 = arith.constant 0 : i32
    return %c0_i32, %c0_i32_0 : i32, i32
  }
  func.func @transform_6(%arg0: i32, %arg1: i32) -> (i32, i32) {
    %c0_i32 = arith.constant 0 : i32
    %c0_i32_0 = arith.constant 0 : i32
    %c0_i32_1 = arith.constant 0 : i32
    return %c0_i32, %c0_i32_0 : i32, i32
  }
  func.func @transform_7(%arg0: i32, %arg1: i32) -> (i32, i32, i32) {
    %c0_i32 = arith.constant 0 : i32
    %c0_i32_0 = arith.constant 0 : i32
    return %arg0, %c0_i32, %arg1 : i32, i32, i32
  }
}

</mosaic_0001>

<bundles_post_ra>
// kernel: decoder_forward.1
= control target key start
LH: loop header
LB: loop body
LE: loop exit
PB: predicated region body
PF: predicated region fallthrough
CT: control target
= control target key end

     0   :  { %s846_s24 = smov 0   ;;  %s848_s25 = smov 0   ;;  %s926_s0 = inlined_call_operand.vmem [shape: f32[2,8,3], index: 0, kind: input, shape index: {}]   ;;  %s927_s1 = inlined_call_operand.vmem [shape: f32[2,1,128], index: 1, kind: input, shape index: {}]   ;;  %s928_s2 = inlined_call_operand.vmem [shape: f32[3,128], index: 2, kind: input, shape index: {}]   ;;  %s929_s3 = inlined_call_operand.vmem [shape: bf16[128,128], index: 3, kind: input, shape index: {}]   ;;  %s930_s4 = inlined_call_operand.vmem [shape: f32[1,128], index: 4, kind: input, shape index: {}]   ;;  %s931_s5 = inlined_call_operand.vmem [shape: bf16[8,128], index: 5, kind: input, shape index: {}]   ;;  %s932_s6 = inlined_call_operand.vmem [shape: f32[8,1], index: 6, kind: input, shape index: {}]   ;;  %s933_s7 = inlined_call_operand.vmem [shape: f32[2,2,8], index: 7, kind: output, shape index: {}]  }
   0x1   :  { %s850_s26 = smov 0  }
   0x2 LB: > { %s29_s27 = sadd.s32 1, %s797_s25  ;;  %p678_p0 = scmp.ge.s32.totalorder %s801_s26, 1  ;;  %s801_s26 = sphi %s850_s26, %s17_s26   ;;  %s797_s25 = sphi %s848_s25, %s935_s25   ;;  %s793_s24 = sphi %s846_s24, %s934_s24  }
   0x3   : > { %p31_p1 = scmp.ge.s32.totalorder %s29_s27, 2  ;;  %p263_p2 = scmp.lt.s32.totalorder %s801_s26, 3 }
   0x5   : > { %s937_s27 = smov (%p31_p1, %s29_s27), 0  ;;  %p264_p3 = pnand %p678_p0, %p263_p2 }
   0x6   : > { %v321_v0 = vld [vmem:[%s928_s2] sm:$0x7] (!%p264_p3)  ;;  %vm333_vm0 = vcmask (!%p264_p3), 1042432   ;;  %p302_p4 = scmp.lt.s32.totalorder (!%p264_p3), %s793_s24, 1  ;;  %v803_v1 = vmov (!%p264_p3), 0.0   ;;  %vm804_vm1 = vmmov (!%p264_p3), 0   ;;  %v569_v40 = vlaneseq (!%p264_p3) }
   0x7   : > { %267 = sbr.rel (%p264_p3) target bundleno = 713 (0x2c9), region = 48  ;;  %708 = vmatprep.subr.mxu0 (!%p264_p3), %v803_v1  ;;  %710 = vmatprep.mubr.msk.f32.mxu0 (!%p264_p3), %vm804_vm1, %v803_v1  ;;  %v767_v2 = vld [vmem:[%s929_s3] sm:$0xff] (!%p264_p3)   ;;  %v768_v3 = vld [vmem:[%s929_s3 + $0x8] sm:$0xff] (!%p264_p3)   ;;  %vm329_vm2 = vcmask (!%p264_p3), 23552   ;;  %v769_v5 = vld [vmem:[%s929_s3 + $0x10] sm:$0xff] (!%p264_p3)   ;;  %v805_v11 = vmov (!%p264_p3), 0  }
   0x8   : > { %709 = vmatpush3.msk.msra.mxu0 (!%p264_p3), %vm333_vm0, %v321_v0  ;;  %713 = vmatprep.subr.bf16.mxu1 (!%p264_p3), %v803_v1  ;;  %v770_v6 = vld [vmem:[%s929_s3 + $0x18] sm:$0xff] (!%p264_p3)   ;;  %v771_v7 = vld [vmem:[%s929_s3 + $0x20] sm:$0xff] (!%p264_p3)   ;;  %v772_v8 = vld [vmem:[%s929_s3 + $0x28] sm:$0xff] (!%p264_p3)   ;;  %v570_v45 = vshrl.u32 (!%p264_p3), %v569_v40, 7  ;;  %vm589_vm6 = vcmask (!%p264_p3), 58368  }
   0x9   : > { %714 = vmatpush3.bf16.msra.mxu1 (!%p264_p3), %v767_v2  ;;  %729 = vmatprep.mubr.msk.bf16.mxu1 (!%p264_p3), %vm804_vm1, %v803_v1  ;;  %v773_v9 = vld [vmem:[%s929_s3 + $0x30] sm:$0xff] (!%p264_p3)   ;;  %v774_v10 = vld [vmem:[%s929_s3 + $0x38] sm:$0xff] (!%p264_p3)   ;;  %v523_v18 = vld [vmem:[%s932_s6] sm:$0xff] (!%p264_p3) }
   0xa   : > { %715 = vmatprep.subr.bf16.mxu1 (!%p264_p3), %v803_v1  ;;  %733 = vmatprep.subr.bf16.mxu0 (!%p264_p3), %v803_v1  ;;  %v684_v19 = vld [vmem:[%s930_s4] ss:$0 sm:$0xff] (!%p264_p3)  ;;  %vm571_vm5 = vcmp.eq.s32.totalorder (!%p264_p3), %v570_v45, 1 }
   0xb   : > { %766 = vset.pattern.permute.xlu0 (!%p264_p3), %v805_v11  ;;  %v522_v27 = vld [vmem:[%s931_s5] sm:$0xf] (!%p264_p3) }
   0xc   : > { %526 = vperm.xlu0 (!%p264_p3), %766, %v523_v18  }
   0xd   : > { %716 = vmatpush3.bf16.msra.mxu1 (!%p264_p3), %v768_v3 }
   0xe   : > { %s939_s24 = smov (!%p302_p4, %s793_s24), 1  ;;  %717 = vmatprep.subr.bf16.mxu1 %v803_v1 }
   0xf   : > { %s679_s11 = sshll.u32 %s939_s24, 3  ;;  %s311_s10 = scalar_lea.vmem %s927_s1, %s939_s24 }
  0x10   : > { %s308_s14 = scalar_lea.vmem %s926_s0, %s679_s11  ;;  %v681_v12 = vld [vmem:[%s311_s10] ss:$0 sm:$0xff]  ;;  %s680_s17 = sshll.u32 %s939_s24, 1 }
  0x11   : > { %v320_v4 = vld [vmem:[%s308_s14] sm:$0xff]  ;;  %718 = vmatpush3.bf16.msra.mxu1 %v769_v5  ;;  %s318_s20 = scalar_lea.vmem %s933_s7, %s680_s17 }
  0x12   : > { %711 = vmatmul.mubr.msk.f32.vlgmr.msra.gmra.mrb[0].mxu0 %vm329_vm2, %v320_v4  ;;  %719 = vmatprep.subr.bf16.mxu1 %v803_v1 }
  0x13   : > { %735 = vmatprep.mubr.msk.bf16.mxu0 %vm804_vm1, %v803_v1 }
  0x15   : > { %720 = vmatpush3.bf16.msra.mxu1 %v770_v6 }
  0x16   : > { %721 = vmatprep.subr.bf16.mxu1 %v803_v1 }
  0x19   : > { %722 = vmatpush3.bf16.msra.mxu1 %v771_v7 }
  0x1a   : > { %723 = vmatprep.subr.bf16.mxu1 %v803_v1 }
  0x1d   : > { %724 = vmatpush3.bf16.msra.mxu1 %v772_v8 }
  0x1e   : > { %725 = vmatprep.subr.bf16.mxu1 %v803_v1 }
  0x21   : > { %726 = vmatpush3.bf16.msra.mxu1 %v773_v9 }
  0x22   : > { %727 = vmatprep.subr.bf16.mxu1 %v803_v1 }
  0x25   : > { %728 = vmatpush3.bf16.msra.mxu1 %v774_v10 }
  0x8b   : > { %v527_v28 = vpop.permute.xlu0 %526 }
  0xe5   : > { %v403_v13 = vpop.f32.mrb[0].mxu0 }
  0xe6   : > { %v404_v14 = vadd.f32 %v681_v12, %v403_v13  ;;  %v712_v15 = vpop.f32.mrb[1].mxu0 }
  0xe8   : > { %v407_v16 = vpack.c.bf16 %v404_v14, %v404_v14 }
  0xea   : > { %v408_v17 = vmax.bf16 %v805_v11, %v407_v16 }
  0xec   : > { %730 = vmatmul.mubr.bf16.vlgmr.msra.gmra.mrb[0].mxu1 %v408_v17 }
 0x1bf   : > { %v514_v20 = vpop.f32.mrb[0].mxu1 }
 0x1c0   : > { %v515_v21 = vadd.f32 %v684_v19, %v514_v20  ;;  %v731_v22 = vpop.f32.mrb[1].mxu1 }
 0x1c1   : > { %v517_v23 = vpop.f32.mrb[2].mxu1 }
 0x1c2   : > { %v520_v24 = vpack.c.bf16 %v515_v21, %v515_v21  ;;  %v732_v25 = vpop.f32.mrb[3].mxu1 }
 0x1c4   : > { %v521_v26 = vmax.bf16 %v805_v11, %v520_v24 }
 0x1c6   : > { %734 = vmatpush3.bf16.xpose.msra.mxu0 %v521_v26 }
 0x1cd   : > { %736 = vmatmul.mubr.bf16.vlgmr.msra.gmra.mrb[4].mxu0 %v522_v27 }
 0x2a0   : > { %v563_v29 = vpop.f32.mrb[4].mxu0 }
 0x2a1   : > { %v564_v30 = vadd.f32 %v563_v29, %v527_v28  ;;  %v737_v31 = vpop.f32.mrb[5].mxu0 }
 0x2a2   : > { %v566_v32 = vpop.f32.mrb[6].mxu0 }
 0x2a3   : > { %v573_v33 = vmin.f32 %v564_v30, 20.0  ;;  %v738_v34 = vpop.f32.mrb[7].mxu0  ;;  %vm572_vm4 = vcmp.gt.f32.partialorder %v564_v30, 20.0 }
 0x2a5   : > { %v574_v35 = vmul.f32 1.442695, %v573_v33 }
 0x2a7   : > { %775 = vpow2.f32 %v574_v35 }
 0x2b1   : > { %v776_v36 = vpop.eup %775 }
 0x2b2   : > { %v576_v37 = vadd.f32 1.0, %v776_v36  ;;  %v579_v38 = vmul.f32 -0.5, %v776_v36  ;;  %v582_v41 = vand.u32 2147483647, %v776_v36 }
 0x2b4   : > { %777 = vlog2.f32 %v576_v37  ;;  %v580_v39 = vadd.f32 1.0, %v579_v38  ;;  %vm583_vm3 = vcmp.lt.f32.partialorder %v582_v41, 0.0004427343 }
 0x2b6   : > { %v581_v44 = vmul.f32 %v776_v36, %v580_v39 }
 0x2be   : > { %v778_v42 = vpop.eup %777 }
 0x2bf   : > { %v578_v43 = vmul.f32 0.6931472, %v778_v42 }
 0x2c1   : > { %v584_v46 = vsel %vm583_vm3, %v581_v44, %v578_v43 }
 0x2c2   : > { %v585_v47 = vsel %vm572_vm4, %v564_v30, %v584_v46 }
 0x2c3   : > { %v586_v48 = vmul.f32 0.9, %v585_v47 }
 0x2c5   : > { %v587_v49 = vadd.f32 0.1, %v586_v48 }
 0x2c7   : > { %v588_v50 = vsel %vm571_vm5, %v587_v49, %v564_v30 }
 0x2c8   : > { %590 = vst.msk [vmem:[%s318_s20] sm:$0x3] %vm589_vm6, %v588_v50 }
 0x2c9 PF: > { %s17_s26 = sadd.s32 1, %s801_s26   ;;  %s934_s24 = smov %s797_s25 }
 0x2ca   : > { %p14_p5 = scmp.ge.s32.totalorder %s17_s26, 4   ;;  %s935_s25 = smov %s937_s27 }
 0x2cc   :  { %16 = sbr.rel (!%p14_p5) target bundleno = 2 (0x2), region = 81 }

</bundles_post_ra>
